<compile_context>
chip_gen: v5e
topology: v5e:2x2
jax: 0.10.0
libtpu: 0.0.40
codegen_flags: <defaults>
</compile_context>

<pallas_src>
import jax
import jax.numpy as jnp
from jax import lax
from jax.experimental import pallas as pl
from jax.experimental.pallas import tpu as pltpu


LANE = 128


def _round_up(x, m):
    return ((x + m - 1) // m) * m


def _pick_row_tile(total, target):
    """Largest multiple of 8 <= target that divides `total` (total % 8 == 0)."""
    assert total % 8 == 0 and total >= 8
    t = max(8, min(int(target), total))
    t = (t // 8) * 8
    while total % t:          # total is a multiple of 8 -> terminates at 8
        t -= 8
    return t


# ---------------------------------------------------------------------------
# Pallas kernels
# ---------------------------------------------------------------------------

def encoder_mlp_kernel(feat_ref, mask_ref, w1_ref, b1_ref, w2_ref, b2_ref,
                       out_ref):
    """Event-encoder MLP with the attention mask fused in.

    feat_ref : [rows_blk, Fin]   time-major flattened features
    mask_ref : [rows_blk, 1]     attention mask (broadcast over Hp in-kernel)
    out_ref  : [rows_blk, Hp]    masked event embeddings (lane-dense Hp)
    """
    h = jnp.dot(feat_ref[...], w1_ref[...], preferred_element_type=jnp.float32)
    h = jnp.maximum(h + b1_ref[...], 0.0)
    emb = jnp.dot(h, w2_ref[...], preferred_element_type=jnp.float32) + b2_ref[...]
    out_ref[...] = emb * mask_ref[...]


def gru_head_kernel(x_ref, w_ih_ref, w_hh_ref, b_gi_ref, b_hn_ref,
                    w_out_ref, b_out_ref, out_ref, seq_ref, gi_ref):
    """Stacked unidirectional GRU (fused, lane-aligned gates) -> Linear(h[-1]).

    Runs on one batch tile of size `tb` (grid axis 0 is parallel over tiles).

    x_ref    : [T, tb, Hp]    masked event embeddings, time-major
    w_ih_ref : [L, Hp, 3Hp]   fused, pre-transposed, lane-padded input weights (r|z|n)
    w_hh_ref : [L, Hp, 3Hp]   fused, pre-transposed, lane-padded hidden weights
    b_gi_ref : [L, 1, 3Hp]    b_ih with b_hh folded in for the r,z gates
    b_hn_ref : [L, 1, Hp]     hidden bias of the n gate (kept separate)
    w_out_ref: [Hp, O]        pre-transposed, row-padded output-linear weight
    b_out_ref: [1, O]
    out_ref  : [tb, O]
    seq_ref  : VMEM scratch [T*tb, Hp]   inter-layer sequence
    gi_ref   : VMEM scratch [T*tb, 3Hp]  precomputed input-gate projections
    """
    T, tb, Hp = x_ref.shape
    L = w_ih_ref.shape[0]

    # modest unroll so the scheduler can overlap EUP/VPU of step t with the
    # gi load + MXU push of step t+1; full unroll only for short sequences.
    unroll = True if T <= 32 else 4

    h_last = None
    for l in range(L):  # num_layers is small & static: unrolled
        # hoist loop-invariant weight / bias loads out of the time loop
        w_ih_l = w_ih_ref[l]            # [Hp, 3Hp]
        w_hh_l = w_hh_ref[l]            # [Hp, 3Hp]
        b_gi_l = b_gi_ref[l]            # [1, 3Hp]
        b_hn_l = b_hn_ref[l]            # [1, Hp]
        last_layer = (l == L - 1)

        # input->hidden projection for the WHOLE layer in one wide matmul
        # (no recurrent dependency -> hoisted out of the serial time loop).
        # Layer 0 reads the x block directly (no seq <- x copy); the reshape
        # merges leading dims only (tb % 8 == 0), so it is layout-preserving.
        src = x_ref[...].reshape(T * tb, Hp) if l == 0 else seq_ref[...]
        gi_ref[...] = (
            jnp.dot(src, w_ih_l, preferred_element_type=jnp.float32) + b_gi_l)

        def step(t, h, w_hh_l=w_hh_l, b_hn_l=b_hn_l, last_layer=last_layer):
            row = pl.multiple_of(t * tb, tb)
            gi = gi_ref[pl.ds(row, tb), :]                           # [tb, 3Hp]
            gh = jnp.dot(h, w_hh_l, preferred_element_type=jnp.float32)
            # gate slices start at lane multiples of 128 (Hp % 128 == 0)
            r = jax.nn.sigmoid(gi[:, 0:Hp] + gh[:, 0:Hp])
            z = jax.nn.sigmoid(gi[:, Hp:2 * Hp] + gh[:, Hp:2 * Hp])
            n = jnp.tanh(gi[:, 2 * Hp:] + r * (gh[:, 2 * Hp:] + b_hn_l))
            h_new = (1.0 - z) * n + z * h
            if not last_layer:  # last layer's sequence output is unused
                seq_ref[pl.ds(row, tb), :] = h_new
            return h_new

        h_last = lax.fori_loop(0, T, step, jnp.zeros((tb, Hp), jnp.float32),
                               unroll=unroll)
        # TODO(synk): inter-layer dropout (p=0.1) is a training-mode op; the
        # eval/forward pass is the identity, so it is omitted here.

    # out = Linear(h[-1])   (padded lanes of h are exactly zero by construction)
    out_ref[...] = (
        jnp.dot(h_last, w_out_ref[...], preferred_element_type=jnp.float32)
        + b_out_ref[...])


# ---------------------------------------------------------------------------
# Wrappers
# ---------------------------------------------------------------------------

def encoder_mlp(feat2d, mask2d, w1, b1, w2, b2, *, block_rows=512):
    rows, fin = feat2d.shape
    eh = w1.shape[1]
    hp = w2.shape[1]

    # derive the row tile from a VMEM budget (double-buffered in/out tiles +
    # weights); cap at `block_rows`, keep it a divisor of rows & multiple of 8.
    weight_bytes = 4 * (fin * eh + eh + eh * hp + hp)
    bytes_per_row = 4 * 2 * (fin + 1 + hp)        # x, mask, out * double-buffer
    budget = 24 * 1024 * 1024 - 2 * weight_bytes
    cap = max(8, (budget // bytes_per_row) // 8 * 8)
    blk = _pick_row_tile(rows, min(block_rows, cap))

    return pl.pallas_call(
        encoder_mlp_kernel,
        out_shape=jax.ShapeDtypeStruct((rows, hp), jnp.float32),
        grid=(rows // blk,),
        in_specs=[
            pl.BlockSpec((blk, fin), lambda i: (i, 0)),
            pl.BlockSpec((blk, 1), lambda i: (i, 0)),
            pl.BlockSpec((fin, eh), lambda i: (0, 0)),
            pl.BlockSpec((1, eh), lambda i: (0, 0)),
            pl.BlockSpec((eh, hp), lambda i: (0, 0)),
            pl.BlockSpec((1, hp), lambda i: (0, 0)),
        ],
        out_specs=pl.BlockSpec((blk, hp), lambda i: (i, 0)),
        compiler_params=pltpu.CompilerParams(
            dimension_semantics=("parallel",),
            vmem_limit_bytes=32 * 1024 * 1024),
    )(feat2d, mask2d, w1, b1, w2, b2)


def gru_head(x3d, w_ih_f, w_hh_f, b_gi, b_hn, w_out_t, b_out, *, batch_tile=8):
    """x3d: [T, Bp, Hp] time-major masked embeddings -> [Bp, O]."""
    T, Bp, Hp = x3d.shape
    L = w_ih_f.shape[0]
    O = w_out_t.shape[1]

    tb = _pick_row_tile(Bp, batch_tile)
    grid = (Bp // tb,)

    # VMEM estimate for the per-tile working set (budget against 64 MiB so the
    # same configuration holds on v7x).
    est = 4 * (2 * T * tb * Hp                      # x block, double-buffered
               + 2 * (2 * L * Hp * 3 * Hp           # w_ih + w_hh
                      + L * 3 * Hp + L * Hp         # biases
                      + Hp * O + O)                 # head
               + T * tb * Hp + T * tb * 3 * Hp      # seq + gi scratch
               + 2 * tb * O)                        # out block
    vmem_limit = int(min(64 * 1024 * 1024, max(32 * 1024 * 1024, est * 5 // 4)))
    # TODO(synk): at very large T the gi scratch should additionally be chunked
    # over time (double-buffered time blocks) instead of holding all T steps.

    return pl.pallas_call(
        gru_head_kernel,
        out_shape=jax.ShapeDtypeStruct((Bp, O), jnp.float32),
        grid=grid,
        in_specs=[
            pl.BlockSpec((T, tb, Hp), lambda i: (0, i, 0)),
            pl.BlockSpec((L, Hp, 3 * Hp), lambda i: (0, 0, 0)),
            pl.BlockSpec((L, Hp, 3 * Hp), lambda i: (0, 0, 0)),
            pl.BlockSpec((L, 1, 3 * Hp), lambda i: (0, 0, 0)),
            pl.BlockSpec((L, 1, Hp), lambda i: (0, 0, 0)),
            pl.BlockSpec((Hp, O), lambda i: (0, 0)),
            pl.BlockSpec((1, O), lambda i: (0, 0)),
        ],
        out_specs=pl.BlockSpec((tb, O), lambda i: (i, 0)),
        scratch_shapes=[
            pltpu.VMEM((T * tb, Hp), jnp.float32),       # inter-layer sequence
            pltpu.VMEM((T * tb, 3 * Hp), jnp.float32),   # input-gate projections
        ],
        compiler_params=pltpu.CompilerParams(
            dimension_semantics=("parallel",),
            vmem_limit_bytes=vmem_limit),
    )(x3d, w_ih_f, w_hh_f, b_gi, b_hn, w_out_t, b_out)


def gru_model_forward(params, cat_features, cont_features, attention_mask):
    """Forward pass matching GRUModel.forward.

    cat_features   : int32  [B, T, n_cat]
    cont_features  : float32[B, T, n_cont]
    attention_mask : int32  [B, T]
    returns        : float32[B, output_dim]
    """
    B, T, _ = cat_features.shape
    Hp = params["w2"].shape[1]          # lane-padded hidden dim

    # pad batch to a multiple of 8 so every [tb, Hp] tile is sublane-aligned
    B_pad = ((B + 7) // 8) * 8
    pad = B_pad - B
    if pad:
        cat_features = jnp.pad(cat_features, ((0, pad), (0, 0), (0, 0)))
        cont_features = jnp.pad(cont_features, ((0, pad), (0, 0), (0, 0)))
        attention_mask = jnp.pad(attention_mask, ((0, pad), (0, 0)))

    # --- EventEncoder embedding lookups (gather) stay in plain JAX glue ---
    # features are built time-major so the Pallas encoder writes the [T*Bp, Hp]
    # slab the recurrence kernel consumes directly.
    cat_t = jnp.transpose(cat_features, (1, 0, 2))        # [T, Bp, n_cat]
    cont_t = jnp.transpose(cont_features, (1, 0, 2))      # [T, Bp, n_cont]
    embs = [
        jnp.take(tbl, cat_t[..., i], axis=0)              # [T, Bp, enc_hidden]
        for i, tbl in enumerate(params["emb_tables"])
    ]
    feat = jnp.concatenate(embs + [cont_t.astype(jnp.float32)], axis=-1)
    rows = T * B_pad
    feat2d = feat.reshape(rows, feat.shape[-1])            # [T*Bp, Fin]
    mask2d = attention_mask.astype(jnp.float32).T.reshape(rows, 1)

    # encoder MLP (+ fused masking), tiled over rows with a parallel grid.
    x_flat = encoder_mlp(feat2d, mask2d, params["w1"], params["b1"],
                         params["w2"], params["b2"])       # [T*Bp, Hp]
    x3d = x_flat.reshape(T, B_pad, Hp)                     # free reshape
    # TODO(synk): fusing the encoder output directly into the GRU layer-0 gi
    # precompute would save one HBM round trip of the activation slab.

    # GRU recurrence + output Linear inside one Pallas kernel (batch-parallel)
    out_padded = gru_head(x3d,
                          params["w_ih_f"], params["w_hh_f"],
                          params["b_gi"], params["b_hn"],
                          params["w_out_t"], params["b_out"],
                          batch_tile=8)
    return out_padded[:B]


# ---------------------------------------------------------------------------
# Deterministic parameter init (+ gate fusion & lane padding) + example run
# ---------------------------------------------------------------------------

def init_params(key, vocab_sizes, n_cont, enc_hidden, hidden, out_dim,
                num_layers):
    keys = jax.random.split(key, 16)
    s = 0.1
    Hp = _round_up(hidden, LANE)
    pad_h = Hp - hidden

    emb_tables = [
        (s * jax.random.normal(keys[i], (v, enc_hidden))).astype(jnp.float32)
        for i, v in enumerate(vocab_sizes)
    ]
    fin = len(vocab_sizes) * enc_hidden + n_cont

    # per-gate torch-layout GRU params, gate order (r, z, n), pre-transposed so
    # the kernel computes x @ W_g (equivalent to x @ W_g^T in torch layout).
    w_ih_g = (s * jax.random.normal(keys[12], (num_layers, 3, hidden, hidden))).astype(jnp.float32)
    w_hh_g = (s * jax.random.normal(keys[13], (num_layers, 3, hidden, hidden))).astype(jnp.float32)
    b_ih_g = (s * jax.random.normal(keys[14], (num_layers, 3, 1, hidden))).astype(jnp.float32)
    b_hh_g = (s * jax.random.normal(keys[15], (num_layers, 3, 1, hidden))).astype(jnp.float32)

    # lane-pad each gate to Hp (zero rows for padded inputs, zero cols for
    # padded outputs -> padded hidden lanes stay exactly zero through the GRU)
    w_ih_g = jnp.pad(w_ih_g, ((0, 0), (0, 0), (0, pad_h), (0, pad_h)))
    w_hh_g = jnp.pad(w_hh_g, ((0, 0), (0, 0), (0, pad_h), (0, pad_h)))
    b_ih_g = jnp.pad(b_ih_g, ((0, 0), (0, 0), (0, 0), (0, pad_h)))
    b_hh_g = jnp.pad(b_hh_g, ((0, 0), (0, 0), (0, 0), (0, pad_h)))

    # fuse the three gates along the lane axis: [L, Hp, 3Hp]; each gate slot is
    # Hp (a multiple of 128) wide, so in-kernel gate slices are lane-aligned.
    w_ih_f = jnp.concatenate([w_ih_g[:, 0], w_ih_g[:, 1], w_ih_g[:, 2]], axis=-1)
    w_hh_f = jnp.concatenate([w_hh_g[:, 0], w_hh_g[:, 1], w_hh_g[:, 2]], axis=-1)
    # fold the hidden biases of r,z into the precomputed input gates; the n
    # gate's hidden bias must stay separate (it is multiplied by r).
    b_gi = jnp.concatenate([b_ih_g[:, 0] + b_hh_g[:, 0],
                            b_ih_g[:, 1] + b_hh_g[:, 1],
                            b_ih_g[:, 2]], axis=-1)          # [L, 1, 3Hp]
    b_hn = b_hh_g[:, 2]                                       # [L, 1, Hp]

    # encoder MLP (w2/b2 lane-padded to Hp; padded output columns are zero)
    w2 = (s * jax.random.normal(keys[10], (enc_hidden, hidden))).astype(jnp.float32)
    b2 = (s * jax.random.normal(keys[11], (1, hidden))).astype(jnp.float32)
    w2 = jnp.pad(w2, ((0, 0), (0, pad_h)))
    b2 = jnp.pad(b2, ((0, 0), (0, pad_h)))

    # output head (pre-transposed nn.Linear weight, rows padded to Hp)
    w_out_t = (s * jax.random.normal(keys[6], (hidden, out_dim))).astype(jnp.float32)
    w_out_t = jnp.pad(w_out_t, ((0, pad_h), (0, 0)))
    b_out = (s * jax.random.normal(keys[7], (1, out_dim))).astype(jnp.float32)

    return {
        "emb_tables": emb_tables,
        "w1": (s * jax.random.normal(keys[8], (fin, enc_hidden))).astype(jnp.float32),
        "b1": (s * jax.random.normal(keys[9], (1, enc_hidden))).astype(jnp.float32),
        "w2": w2, "b2": b2,
        "w_ih_f": w_ih_f, "w_hh_f": w_hh_f, "b_gi": b_gi, "b_hn": b_hn,
        "w_out_t": w_out_t, "b_out": b_out,
    }


if __name__ == "__main__":
    B, T = 2, 8
    vocab_sizes = [11, 7]          # 2 categorical features
    n_cont = 3                     # 3 continuous features
    enc_hidden = 16                # encoder_hidden_dim
    hidden = 32                    # hidden_dim (GRU input_size == hidden_size)
    out_dim = 5                    # output_dim
    num_layers = 3

    key = jax.random.PRNGKey(0)
    k_par, k_cat0, k_cat1, k_cont, k_len = jax.random.split(key, 5)

    params = init_params(k_par, vocab_sizes, n_cont, enc_hidden, hidden,
                         out_dim, num_layers)

    cat0 = jax.random.randint(k_cat0, (B, T, 1), 0, vocab_sizes[0], dtype=jnp.int32)
    cat1 = jax.random.randint(k_cat1, (B, T, 1), 0, vocab_sizes[1], dtype=jnp.int32)
    cat_features = jnp.concatenate([cat0, cat1], axis=-1)            # [B, T, 2]
    cont_features = jax.random.normal(k_cont, (B, T, n_cont), dtype=jnp.float32)
    lengths = jax.random.randint(k_len, (B,), T // 2, T + 1)
    attention_mask = (jnp.arange(T)[None, :] < lengths[:, None]).astype(jnp.int32)

    out = gru_model_forward(params, cat_features, cont_features, attention_mask)
    out = jax.block_until_ready(out)
    assert out.shape == (B, out_dim)
    print("KERNEL_OK")
</pallas_src>

<mosaic_0001>
module attributes {stable_mosaic.version = 11 : i64} {
  func.func @encoder_mlp_kernel(%arg0: i32, %arg1: memref<64x35xf32, #tpu.memory_space<vmem>>, %arg2: memref<64x1xf32, #tpu.memory_space<vmem>>, %arg3: memref<35x16xf32, #tpu.memory_space<vmem>>, %arg4: memref<1x16xf32, #tpu.memory_space<vmem>>, %arg5: memref<16x128xf32, #tpu.memory_space<vmem>>, %arg6: memref<1x128xf32, #tpu.memory_space<vmem>>, %arg7: memref<64x128xf32, #tpu.memory_space<vmem>>) attributes {dimension_semantics = [#tpu.dimension_semantics<parallel>], iteration_bounds = array<i64: 1>, scalar_prefetch = 0 : i64, scratch_operands = 0 : i64, tpu.core_type = #tpu.core_type<tc>, window_params = [{transform_indices = @transform_0, window_bounds = array<i64: 64, 35>}, {transform_indices = @transform_1, window_bounds = array<i64: 64, 1>}, {pipeline_mode = #tpu.pipeline_mode<synchronous>, transform_indices = @transform_2, window_bounds = array<i64: 35, 16>}, {pipeline_mode = #tpu.pipeline_mode<synchronous>, transform_indices = @transform_3, window_bounds = array<i64: 1, 16>}, {pipeline_mode = #tpu.pipeline_mode<synchronous>, transform_indices = @transform_4, window_bounds = array<i64: 16, 128>}, {pipeline_mode = #tpu.pipeline_mode<synchronous>, transform_indices = @transform_5, window_bounds = array<i64: 1, 128>}, {transform_indices = @transform_6, window_bounds = array<i64: 64, 128>}]} {
    %c0 = arith.constant 0 : index
    %c0_0 = arith.constant 0 : index
    %0 = vector.load %arg1[%c0, %c0_0] : memref<64x35xf32, #tpu.memory_space<vmem>>, vector<64x35xf32>
    %c0_1 = arith.constant 0 : index
    %c0_2 = arith.constant 0 : index
    %1 = vector.load %arg3[%c0_1, %c0_2] : memref<35x16xf32, #tpu.memory_space<vmem>>, vector<35x16xf32>
    %cst = arith.constant dense<0.000000e+00> : vector<64x16xf32>
    %2 = tpu.matmul %0, %1, %cst {dimension_numbers = #tpu.dot_dimension_numbers<[1], [0], [0], [1], [0, 0, 1, 1], [], []>} : vector<64x35xf32>, vector<35x16xf32>, vector<64x16xf32> -> vector<64x16xf32>
    %c0_3 = arith.constant 0 : index
    %c0_4 = arith.constant 0 : index
    %3 = vector.load %arg4[%c0_3, %c0_4] : memref<1x16xf32, #tpu.memory_space<vmem>>, vector<1x16xf32>
    %4 = vector.broadcast %3 : vector<1x16xf32> to vector<64x16xf32>
    %5 = arith.addf %2, %4 : vector<64x16xf32>
    %cst_5 = arith.constant 0.000000e+00 : f32
    %6 = vector.broadcast %cst_5 : f32 to vector<64x16xf32>
    %7 = arith.maximumf %5, %6 : vector<64x16xf32>
    %c0_6 = arith.constant 0 : index
    %c0_7 = arith.constant 0 : index
    %8 = vector.load %arg5[%c0_6, %c0_7] : memref<16x128xf32, #tpu.memory_space<vmem>>, vector<16x128xf32>
    %cst_8 = arith.constant dense<0.000000e+00> : vector<64x128xf32>
    %9 = tpu.matmul %7, %8, %cst_8 {dimension_numbers = #tpu.dot_dimension_numbers<[1], [0], [0], [1], [0, 0, 1, 1], [], []>} : vector<64x16xf32>, vector<16x128xf32>, vector<64x128xf32> -> vector<64x128xf32>
    %c0_9 = arith.constant 0 : index
    %c0_10 = arith.constant 0 : index
    %10 = vector.load %arg6[%c0_9, %c0_10] : memref<1x128xf32, #tpu.memory_space<vmem>>, vector<1x128xf32>
    %11 = vector.broadcast %10 : vector<1x128xf32> to vector<64x128xf32>
    %12 = arith.addf %9, %11 : vector<64x128xf32>
    %c0_11 = arith.constant 0 : index
    %c0_12 = arith.constant 0 : index
    %13 = vector.load %arg2[%c0_11, %c0_12] : memref<64x1xf32, #tpu.memory_space<vmem>>, vector<64x1xf32>
    %14 = vector.broadcast %13 : vector<64x1xf32> to vector<64x128xf32>
    %15 = arith.mulf %12, %14 : vector<64x128xf32>
    %c0_13 = arith.constant 0 : index
    %c0_14 = arith.constant 0 : index
    %16 = vector.load %arg7[%c0_13, %c0_14] : memref<64x128xf32, #tpu.memory_space<vmem>>, vector<64x128xf32>
    tpu.vector_store %arg7[%c0_13, %c0_14], %15 {strides = array<i32>} : memref<64x128xf32, #tpu.memory_space<vmem>>, vector<64x128xf32>,
    return
  }
  func.func @transform_0(%arg0: i32) -> (i32, i32) {
    %c0_i32 = arith.constant 0 : i32
    %c0_i32_0 = arith.constant 0 : i32
    return %arg0, %c0_i32 : i32, i32
  }
  func.func @transform_1(%arg0: i32) -> (i32, i32) {
    %c0_i32 = arith.constant 0 : i32
    %c0_i32_0 = arith.constant 0 : i32
    return %arg0, %c0_i32 : i32, i32
  }
  func.func @transform_2(%arg0: i32) -> (i32, i32) {
    %c0_i32 = arith.constant 0 : i32
    %c0_i32_0 = arith.constant 0 : i32
    %c0_i32_1 = arith.constant 0 : i32
    return %c0_i32, %c0_i32_0 : i32, i32
  }
  func.func @transform_3(%arg0: i32) -> (i32, i32) {
    %c0_i32 = arith.constant 0 : i32
    %c0_i32_0 = arith.constant 0 : i32
    %c0_i32_1 = arith.constant 0 : i32
    return %c0_i32, %c0_i32_0 : i32, i32
  }
  func.func @transform_4(%arg0: i32) -> (i32, i32) {
    %c0_i32 = arith.constant 0 : i32
    %c0_i32_0 = arith.constant 0 : i32
    %c0_i32_1 = arith.constant 0 : i32
    return %c0_i32, %c0_i32_0 : i32, i32
  }
  func.func @transform_5(%arg0: i32) -> (i32, i32) {
    %c0_i32 = arith.constant 0 : i32
    %c0_i32_0 = arith.constant 0 : i32
    %c0_i32_1 = arith.constant 0 : i32
    return %c0_i32, %c0_i32_0 : i32, i32
  }
  func.func @transform_6(%arg0: i32) -> (i32, i32) {
    %c0_i32 = arith.constant 0 : i32
    %c0_i32_0 = arith.constant 0 : i32
    return %arg0, %c0_i32 : i32, i32
  }
}

</mosaic_0001>

<bundles_post_ra>
// kernel: tpu_custom_call.1
= control target key start
LH: loop header
LB: loop body
LE: loop exit
PB: predicated region body
PF: predicated region fallthrough
CT: control target
= control target key end

     0   :  { %vm66_vm0 = vcmask 1042432   ;;  %s465_s0 = inlined_call_operand.vmem [shape: f32[64,35], index: 0, kind: input, shape index: {}]   ;;  %s466_s1 = inlined_call_operand.vmem [shape: f32[64,1], index: 1, kind: input, shape index: {}]   ;;  %s467_s2 = inlined_call_operand.vmem [shape: f32[35,16], index: 2, kind: input, shape index: {}]   ;;  %s468_s3 = inlined_call_operand.vmem [shape: f32[1,16], index: 3, kind: input, shape index: {}]   ;;  %s469_s4 = inlined_call_operand.vmem [shape: f32[16,128], index: 4, kind: input, shape index: {}]   ;;  %s470_s5 = inlined_call_operand.vmem [shape: f32[1,128], index: 5, kind: input, shape index: {}]   ;;  %s471_s6 = inlined_call_operand.hbm [shape: f32[64,128], index: 6, kind: output, shape index: {}]  }
   0x1   :  { %v36_v0 = vld [vmem:[%s467_s2 + $0x20] sm:$0x7]  ;;  %v35_v1 = vld [vmem:[%s467_s2 + $0x18] sm:$0xff]  ;;  %v34_v2 = vld [vmem:[%s467_s2 + $0x10] sm:$0xff] }
   0x2   :  { %273 = vmatpush.msk.msra.mxu0 %vm66_vm0, %v36_v0  ;;  %290 = vmatpush.msk.msra.mxu2 %vm66_vm0, %v36_v0  ;;  %v33_v3 = vld [vmem:[%s467_s2 + $0x8] sm:$0xff] }
   0x4   :  { %82 = vmatpush.msra.mxu0 %v35_v1  ;;  %291 = vmatpush.msra.mxu2 %v35_v1 }
   0x6   :  { %83 = vmatpush.msra.mxu0 %v34_v2  ;;  %292 = vmatpush.msra.mxu2 %v34_v2 }
   0x7   :  { %11 = vsyncpa [#allocation3], 0  ;;  %v32_v4 = vld [vmem:[%s467_s2] sm:$0xff]  ;;  %vm41_vm1 = vcmask 285696   ;;  %v25_v7 = vld [vmem:[%s465_s0 + $0x8] sm:$0xff]  ;;  %v332_v15 = vmov 0  }
   0x8   :  { %84 = vmatpush.msra.mxu0 %v33_v3  ;;  %293 = vmatpush.msra.mxu2 %v33_v3  ;;  %v24_v5 = vld [vmem:[%s465_s0] sm:$0xff]  ;;  %v29_v8 = vld [vmem:[%s465_s0 + $0x28] sm:$0xff]  ;;  %v26_v9 = vld [vmem:[%s465_s0 + $0x10] sm:$0xff]  ;;  %vm125_vm2 = vcmask 130048   ;;  %s261_s20 = sshll.u32 %s471_s6, 4  ;;  %s334_s21 = smov 128   ;;  %s262_s20 = int_to_ptr.hbm [resolvable:$true] %s261_s20 }
   0x9   :  { %v28_v6 = vld [vmem:[%s465_s0 + $0x20] sm:$0xff]  ;;  %v30_v10 = vld [vmem:[%s465_s0 + $0x30] sm:$0xff]  ;;  %v27_v11 = vld [vmem:[%s465_s0 + $0x18] sm:$0xff]  ;;  %302 = vset.pattern.permute.xlu1 %v332_v15  ;;  %301 = vset.pattern.permute.xlu0 %v332_v15  ;;  %s335_s22 = smov 8  }
   0xa   :  { %85 = vmatpush.msra.mxu0 %v32_v4  ;;  %294 = vmatpush.msra.mxu2 %v32_v4  ;;  %v31_v12 = vld [vmem:[%s465_s0 + $0x38] sm:$0xff]  ;;  %v120_v13 = vld [vmem:[%s469_s4 + $0x8] sm:$0xff]  ;;  %v119_v14 = vld [vmem:[%s469_s4] sm:$0xff] }
   0xb   :  { %274 = vmatmul.msk.f32.vlgmr.msra.gmra.mxu0 %vm41_vm1, %v24_v5  ;;  %278 = vmatmul.msk.f32.vlgmr.msra.gmra.mxu2 %vm41_vm1, %v28_v6  ;;  %v193_v16 = vld [vmem:[%s466_s1 + $0x10] sm:$0xff]  ;;  %v191_v17 = vld [vmem:[%s466_s1] sm:$0xff]  ;;  %v194_v19 = vld [vmem:[%s466_s1 + $0x18] sm:$0xff] }
   0xc   :  { %164 = vmatpush.msra.mxu1 %v120_v13  ;;  %295 = vmatpush.msra.mxu3 %v120_v13  ;;  %v304_v18 = vld [vmem:[%s468_s3] ss:$0 sm:$0xff]  ;;  %v192_v20 = vld [vmem:[%s466_s1 + $0x8] sm:$0xff]  ;;  %v198_v24 = vld [vmem:[%s466_s1 + $0x38] sm:$0xff] }
   0xd   :  { %303 = vset.pattern.permute.xlu2 %v332_v15  ;;  %211 = vperm.xlu1 %302, %v193_v16   ;;  %v197_v25 = vld [vmem:[%s466_s1 + $0x30] sm:$0xff]  ;;  %v195_v26 = vld [vmem:[%s466_s1 + $0x20] sm:$0xff]  ;;  %v196_v31 = vld [vmem:[%s466_s1 + $0x28] sm:$0xff] }
   0xe   :  { %165 = vmatpush.msra.mxu1 %v119_v14  ;;  %296 = vmatpush.msra.mxu3 %v119_v14  ;;  %v305_v49 = vld [vmem:[%s470_s5] ss:$0 sm:$0xff]  ;;  %s333_s5 = smov [#allocation2]  }
   0xf   :  { %201 = vperm.xlu0 %301, %v191_v17   ;;  %221 = vperm.xlu2 %303, %v195_v26   ;;  %s259_s17 = sshll.u32 %s333_s5, 4  ;;  %s260_s17 = int_to_ptr.vmem [resolvable:$true] %s259_s17 }
  0x13   :  { %275 = vmatmul.msk.f32.gmra.mxu0 %vm41_vm1, %v25_v7  ;;  %279 = vmatmul.msk.f32.gmra.mxu2 %vm41_vm1, %v29_v8 }
  0x15   :  { %216 = vperm.xlu1 %302, %v194_v19  }
  0x17   :  { %206 = vperm.xlu0 %301, %v192_v20   ;;  %226 = vperm.xlu2 %303, %v196_v31  }
  0x1b   :  { %276 = vmatmul.msk.f32.gmra.mxu0 %vm41_vm1, %v26_v9  ;;  %280 = vmatmul.msk.f32.gmra.mxu2 %vm41_vm1, %v30_v10 }
  0x1d   :  { %236 = vperm.xlu1 %302, %v198_v24  }
  0x1f   :  { %231 = vperm.xlu0 %301, %v197_v25  }
  0x23   :  { %277 = vmatmul.msk.f32.gmra.mxu0 %vm41_vm1, %v27_v11  ;;  %281 = vmatmul.msk.f32.gmra.mxu2 %vm41_vm1, %v31_v12 }
  0x69   :  { %v222_v57 = vpop.permute.xlu2 %221 }
  0x71   :  { %v227_v0 = vpop.permute.xlu2 %226 }
  0x7f   :  { %v212_v59 = vpop.permute.xlu1 %211 }
  0x81   :  { %v202_v50 = vpop.permute.xlu0 %201 }
  0x87   :  { %v217_v5 = vpop.permute.xlu1 %216 }
  0x88   :  { %v87_v21 = vpop.f32.mrf.mxu0 }
  0x89   :  { %v88_v22 = vadd.f32 %v304_v18, %v87_v21  ;;  %v207_v55 = vpop.permute.xlu0 %206 }
  0x8b   :  { %v111_v23 = vmax.f32 %v88_v22, 0.0 }
  0x8d   :  { %282 = vmatmul.msk.f32.vlgmr.msra.gmra.mxu1 %vm125_vm2, %v111_v23 }
  0x8e   :  { %v99_v27 = vpop.f32.mrf.mxu2 }
  0x8f   :  { %v100_v45 = vadd.f32 %v304_v18, %v99_v27  ;;  %v237_v16 = vpop.permute.xlu1 %236 }
  0x90   :  { %v90_v28 = vpop.f32.mrf.mxu0 }
  0x91   :  { %v91_v29 = vadd.f32 %v304_v18, %v90_v28  ;;  %v115_v48 = vmax.f32 %v100_v45, 0.0  ;;  %v232_v9 = vpop.permute.xlu0 %231 }
  0x93   :  { %v112_v30 = vmax.f32 %v91_v29, 0.0 }
  0x95   :  { %283 = vmatmul.msk.f32.gmra.mxu1 %vm125_vm2, %v112_v30 }
  0x96   :  { %v102_v32 = vpop.f32.mrf.mxu2 }
  0x97   :  { %v103_v33 = vadd.f32 %v304_v18, %v102_v32 }
  0x98   :  { %v93_v34 = vpop.f32.mrf.mxu0 }
  0x99   :  { %v116_v35 = vmax.f32 %v103_v33, 0.0  ;;  %v94_v36 = vadd.f32 %v304_v18, %v93_v34 }
  0x9b   :  { %v113_v37 = vmax.f32 %v94_v36, 0.0  ;;  %287 = vmatmul.msk.f32.vlgmr.msra.gmra.mxu3 %vm125_vm2, %v116_v35 }
  0x9d   :  { %284 = vmatmul.msk.f32.gmra.mxu1 %vm125_vm2, %v113_v37 }
  0x9e   :  { %v105_v38 = vpop.f32.mrf.mxu2 }
  0x9f   :  { %v106_v39 = vadd.f32 %v304_v18, %v105_v38 }
  0xa0   :  { %v96_v40 = vpop.f32.mrf.mxu0 }
  0xa1   :  { %v117_v41 = vmax.f32 %v106_v39, 0.0  ;;  %v97_v42 = vadd.f32 %v304_v18, %v96_v40 }
  0xa3   :  { %v114_v43 = vmax.f32 %v97_v42, 0.0  ;;  %288 = vmatmul.msk.f32.gmra.mxu3 %vm125_vm2, %v117_v41 }
  0xa5   :  { %285 = vmatmul.msk.f32.gmra.mxu1 %vm125_vm2, %v114_v43 }
  0xa6   :  { %v108_v44 = vpop.f32.mrf.mxu2 }
  0xa7   :  { %v109_v46 = vadd.f32 %v304_v18, %v108_v44 }
  0xa9   :  { %v118_v47 = vmax.f32 %v109_v46, 0.0 }
  0xab   :  { %289 = vmatmul.msk.f32.gmra.mxu3 %vm125_vm2, %v118_v47 }
  0xad   :  { %286 = vmatmul.msk.f32.gmra.mxu1 %vm125_vm2, %v115_v48 }
 0x10a   :  { %v167_v51 = vpop.f32.mrf.mxu1 }
 0x10b   :  { %v168_v52 = vadd.f32 %v305_v49, %v167_v51 }
 0x10d   :  { %v239_v53 = vmul.f32 %v202_v50, %v168_v52 }
 0x10f   :  { %247 = vst [vmem:[#allocation2] sm:$0xff] %v239_v53 }
 0x112   :  { %v170_v54 = vpop.f32.mrf.mxu1 }
 0x113   :  { %v171_v56 = vadd.f32 %v305_v49, %v170_v54 }
 0x115   :  { %v240_v58 = vmul.f32 %v207_v55, %v171_v56 }
 0x117   :  { %248 = vst [vmem:[#allocation2 + $0x8] sm:$0xff] %v240_v58 }
 0x11a   :  { %v173_v60 = vpop.f32.mrf.mxu1 }
 0x11b   :  { %v174_v61 = vadd.f32 %v305_v49, %v173_v60 }
 0x11d   :  { %v241_v62 = vmul.f32 %v212_v59, %v174_v61 }
 0x11e   :  { %v182_v63 = vpop.f32.mrf.mxu3 }
 0x11f   :  { %249 = vst [vmem:[#allocation2 + $0x10] sm:$0xff] %v241_v62  ;;  %v183_v1 = vadd.f32 %v305_v49, %v182_v63 }
 0x121   :  { %v244_v2 = vmul.f32 %v227_v0, %v183_v1 }
 0x122   :  { %v176_v3 = vpop.f32.mrf.mxu1 }
 0x123   :  { %252 = vst [vmem:[#allocation2 + $0x28] sm:$0xff] %v244_v2  ;;  %v177_v4 = vadd.f32 %v305_v49, %v176_v3 }
 0x125   :  { %v242_v6 = vmul.f32 %v217_v5, %v177_v4 }
 0x126   :  { %v185_v7 = vpop.f32.mrf.mxu3 }
 0x127   :  { %250 = vst [vmem:[#allocation2 + $0x18] sm:$0xff] %v242_v6  ;;  %v186_v8 = vadd.f32 %v305_v49, %v185_v7 }
 0x129   :  { %v245_v10 = vmul.f32 %v232_v9, %v186_v8 }
 0x12a   :  { %v179_v11 = vpop.f32.mrf.mxu1 }
 0x12b   :  { %253 = vst [vmem:[#allocation2 + $0x30] sm:$0xff] %v245_v10  ;;  %v180_v12 = vadd.f32 %v305_v49, %v179_v11 }
 0x12d   :  { %v243_v13 = vmul.f32 %v222_v57, %v180_v12 }
 0x12e   :  { %v188_v14 = vpop.f32.mrf.mxu3 }
 0x12f   :  { %251 = vst [vmem:[#allocation2 + $0x20] sm:$0xff] %v243_v13  ;;  %v189_v15 = vadd.f32 %v305_v49, %v188_v14 }
 0x131   :  { %v246_v17 = vmul.f32 %v237_v16, %v189_v15 }
 0x133   :  { %254 = vst [vmem:[#allocation2 + $0x38] sm:$0xff] %v246_v17 }
 0x134   :  { %267 = dma.vmem_to_hbm [thread:$0]  %s260_s17, 1024, %s262_s20, [#allocation3], %s334_s21, %s334_s21, %s335_s22  }
 0x135   :  { %330 = dma.done.wait [#allocation3], 1024  }
 0x136   :  { %331 = vsyncadd [#allocation3], 4294966272 }
 0x137   :  { %272 = vsyncpa [#allocation3], 1 }

</bundles_post_ra>
